<compile_context>
chip_gen: v5e
topology: v5e:2x2
jax: 0.10.0
libtpu: 0.0.40
codegen_flags: <defaults>
</compile_context>

<pallas_src>
import jax
import jax.numpy as jnp
from jax.experimental import pallas as pl
from jax.experimental.pallas import tpu as pltpu

_MiB = 1024 * 1024


def _vmem_params():
    """Generation-aware VMEM sizing.

    Returns (total budget for the 4 double-buffered x/out tile buffers,
             scoped vmem_limit_bytes to request from the compiler).
    """
    try:
        cap = int(pltpu.get_tpu_info().vmem_capacity_bytes)
    except Exception:
        cap = 64 * _MiB  # conservative fallback (v7x-sized)
    # v5e/v6e (128 MiB physical): 32 MiB of tiles (8 MiB per buffer).
    # v7x (64 MiB physical):      16 MiB of tiles (4 MiB per buffer).
    tile_budget = min(cap // 4, 32 * _MiB)
    # Headroom for the (small) double-buffered mask blocks + compiler scratch,
    # always strictly below physical VMEM.
    vmem_limit = min(cap - 8 * _MiB, 2 * tile_budget + 8 * _MiB)
    return tile_budget, vmem_limit


def _lane_chunk(extent: int, max_elems: int) -> int:
    """Largest legal lane-dim block: the full extent, or a multiple of 128."""
    if extent <= max_elems:
        return extent
    return max(128, (max_elems // 128) * 128)


def _sublane_chunk(extent: int, max_rows: int) -> int:
    """Largest legal sublane-dim block: the full extent, or a multiple of 8."""
    if extent <= max_rows:
        return extent
    return max(8, (max_rows // 8) * 8)


def _vdrop_bth_kernel(x_ref, m_ref, o_ref):
    # x_ref: (bt, tt, hh) tile of x; m_ref: (bt, 1, hh) f32 pre-scaled keep
    # mask, broadcast over the time axis.  Multiply in f32, cast on store.
    o_ref[...] = (x_ref[...] * m_ref[...]).astype(o_ref.dtype)


def _vdrop_2d_kernel(x_ref, m_ref, o_ref):
    # x_ref: (tt, ll) time x (batch*hidden) tile; m_ref: (1, ll) f32 mask.
    o_ref[...] = (x_ref[...] * m_ref[...]).astype(o_ref.dtype)


def variational_dropout(x, dropout: float, key, *,
                        batch_first: bool = False, training: bool = True):
    """JAX/Pallas equivalent of VariationalDropout.forward (dense-tensor path)."""
    if (not training) or dropout <= 0.0:
        return x
    dropout = float(dropout)
    if dropout >= 1.0:
        # 1/(1-p) is undefined; every element is dropped.
        return jnp.zeros_like(x)

    scale = 1.0 / (1.0 - dropout)
    if batch_first:
        B, T, H = x.shape
    else:
        T, B, H = x.shape

    # One Bernoulli keep decision per (batch, hidden) feature, reused at every
    # time step (the "variational" property).  The pre-scaled mask stays in
    # f32 (tiny) so the 1/(1-p) factor is exact even for bf16 activations; the
    # kernel multiplies in f32 and casts back on store.
    keep = jax.random.bernoulli(key, p=1.0 - dropout, shape=(B, H))
    mask = keep.astype(jnp.float32) * jnp.float32(scale)

    itemsize = jnp.dtype(x.dtype).itemsize
    tile_budget, vmem_limit = _vmem_params()
    per_buf_elems = max((tile_budget // 4) // itemsize, 8 * 128)

    cost = pl.CostEstimate(flops=x.size, transcendentals=0,
                           bytes_accessed=2 * x.size * itemsize + mask.size * 4)

    if batch_first:
        # x: (B, T, H).  Grid over (batch tiles, time tiles, hidden tiles) so
        # blocks stay multi-MiB for short sequences (bt > 1) and never bust
        # VMEM for huge H (hh chunked on 128-lane boundaries).
        hh = _lane_chunk(H, per_buf_elems // min(T, 8))
        tt = _sublane_chunk(T, per_buf_elems // hh)
        bt = min(B, max(1, per_buf_elems // (tt * hh)))
        m = mask.reshape(B, 1, H)
        return pl.pallas_call(
            _vdrop_bth_kernel,
            out_shape=jax.ShapeDtypeStruct((B, T, H), x.dtype),
            grid_spec=pltpu.PrefetchScalarGridSpec(
                num_scalar_prefetch=0,
                grid=(pl.cdiv(B, bt), pl.cdiv(T, tt), pl.cdiv(H, hh)),
                in_specs=[
                    pl.BlockSpec((bt, tt, hh), lambda b, t, h: (b, t, h)),
                    pl.BlockSpec((bt, 1, hh), lambda b, t, h: (b, 0, h)),
                ],
                out_specs=pl.BlockSpec((bt, tt, hh), lambda b, t, h: (b, t, h)),
            ),
            compiler_params=pltpu.CompilerParams(
                dimension_semantics=("parallel", "parallel", "parallel"),
                vmem_limit_bytes=vmem_limit),
            cost_estimate=cost,
        )(x, m)

    # batch_first=False: x is (T, B, H).  Collapse the minor (B, H) pair into a
    # single lane dimension (free row-major reshape): blocks fill whole (8,128)
    # tiles even when B < 8, the output lane width is a large multiple of 128
    # (unmasked stores), and the lane axis is chunked so large B*H fits VMEM.
    BH = B * H
    x2 = x.reshape(T, BH)
    m2 = mask.reshape(1, BH)
    ll = _lane_chunk(BH, per_buf_elems // min(T, 8))
    tt = _sublane_chunk(T, per_buf_elems // ll)
    out = pl.pallas_call(
        _vdrop_2d_kernel,
        out_shape=jax.ShapeDtypeStruct((T, BH), x.dtype),
        grid_spec=pltpu.PrefetchScalarGridSpec(
            num_scalar_prefetch=0,
            grid=(pl.cdiv(T, tt), pl.cdiv(BH, ll)),
            in_specs=[
                pl.BlockSpec((tt, ll), lambda t, l: (t, l)),
                pl.BlockSpec((1, ll), lambda t, l: (0, l)),
            ],
            out_specs=pl.BlockSpec((tt, ll), lambda t, l: (t, l)),
        ),
        compiler_params=pltpu.CompilerParams(
            dimension_semantics=("parallel", "parallel"),
            vmem_limit_bytes=vmem_limit),
        cost_estimate=cost,
    )(x2, m2)
    return out.reshape(T, B, H)
    # TODO(synk): PackedSequence inputs have no JAX equivalent; only the dense
    # tensor path is implemented.


if __name__ == "__main__":
    root = jax.random.PRNGKey(0)
    kx1, kx2, kmask = jax.random.split(root, 3)

    B, T, H = 2, 8, 128
    p = 0.3
    scale = 1.0 / (1.0 - p)

    # Reference keep mask (wrapper uses the same key -> identical mask).
    keep = jax.random.bernoulli(kmask, p=1.0 - p, shape=(B, H))
    mask_f32 = keep.astype(jnp.float32) * scale

    # --- batch_first=True path: x is (B, T, H) ------------------------------
    x_bth = jax.random.normal(kx1, (B, T, H), dtype=jnp.float32)
    y_bth = jax.block_until_ready(
        variational_dropout(x_bth, p, kmask, batch_first=True, training=True))
    expected_bth = x_bth * mask_f32[:, None, :]
    assert jnp.allclose(y_bth, expected_bth, atol=1e-5, rtol=1e-5), \
        "batch_first=True values mismatch"
    assert bool(jnp.all(jnp.where(keep[:, None, :], True, y_bth == 0.0))), \
        "mask not shared across time (batch_first=True)"

    # --- batch_first=False path: x is (T, B, H) -----------------------------
    x_tbh = jax.random.normal(kx2, (T, B, H), dtype=jnp.float32)
    y_tbh = jax.block_until_ready(
        variational_dropout(x_tbh, p, kmask, batch_first=False, training=True))
    expected_tbh = x_tbh * mask_f32[None, :, :]
    assert jnp.allclose(y_tbh, expected_tbh, atol=1e-5, rtol=1e-5), \
        "batch_first=False values mismatch"
    assert bool(jnp.all(jnp.where(keep[None, :, :], True, y_tbh == 0.0))), \
        "mask not shared across time (batch_first=False)"

    # --- bf16 input: scale applied exactly (f32 mask, cast on store) --------
    x_bf16 = x_bth.astype(jnp.bfloat16)
    y_bf16 = jax.block_until_ready(
        variational_dropout(x_bf16, p, kmask, batch_first=True, training=True))
    expected_bf16 = (x_bf16.astype(jnp.float32) * mask_f32[:, None, :]
                     ).astype(jnp.bfloat16)
    assert jnp.allclose(y_bf16.astype(jnp.float32),
                        expected_bf16.astype(jnp.float32),
                        atol=1e-2, rtol=1e-2), "bf16 values mismatch"

    # --- eval mode: identity -------------------------------------------------
    y_eval = variational_dropout(x_bth, p, kmask, batch_first=True, training=False)
    assert jnp.allclose(jax.block_until_ready(y_eval), x_bth)

    # --- p >= 1: all zeros ---------------------------------------------------
    y_all = variational_dropout(x_bth, 1.0, kmask, batch_first=True, training=True)
    assert bool(jnp.all(jax.block_until_ready(y_all) == 0.0))

    print("KERNEL_OK")
</pallas_src>

<mosaic_0001>
module attributes {stable_mosaic.version = 11 : i64} {
  func.func @_vdrop_bth_kernel(%arg0: i32, %arg1: i32, %arg2: i32, %arg3: memref<2x8x128xf32, #tpu.memory_space<vmem>>, %arg4: memref<2x1x128xf32, #tpu.memory_space<vmem>>, %arg5: memref<2x8x128xf32, #tpu.memory_space<vmem>>) attributes {dimension_semantics = [#tpu.dimension_semantics<parallel>, #tpu.dimension_semantics<parallel>, #tpu.dimension_semantics<parallel>], iteration_bounds = array<i64: 1, 1, 1>, scalar_prefetch = 0 : i64, scratch_operands = 0 : i64, tpu.core_type = #tpu.core_type<tc>, window_params = [{transform_indices = @transform_0, window_bounds = array<i64: 2, 8, 128>}, {transform_indices = @transform_1, window_bounds = array<i64: 2, 1, 128>}, {transform_indices = @transform_2, window_bounds = array<i64: 2, 8, 128>}]} {
    %c0 = arith.constant 0 : index
    %c0_0 = arith.constant 0 : index
    %c0_1 = arith.constant 0 : index
    %0 = vector.load %arg3[%c0, %c0_0, %c0_1] : memref<2x8x128xf32, #tpu.memory_space<vmem>>, vector<2x8x128xf32>
    %c0_2 = arith.constant 0 : index
    %c0_3 = arith.constant 0 : index
    %c0_4 = arith.constant 0 : index
    %1 = vector.load %arg4[%c0_2, %c0_3, %c0_4] : memref<2x1x128xf32, #tpu.memory_space<vmem>>, vector<2x1x128xf32>
    %2 = vector.broadcast %1 : vector<2x1x128xf32> to vector<2x8x128xf32>
    %3 = arith.mulf %0, %2 : vector<2x8x128xf32>
    %c0_5 = arith.constant 0 : index
    %c0_6 = arith.constant 0 : index
    %c0_7 = arith.constant 0 : index
    %4 = vector.load %arg5[%c0_5, %c0_6, %c0_7] : memref<2x8x128xf32, #tpu.memory_space<vmem>>, vector<2x8x128xf32>
    tpu.vector_store %arg5[%c0_5, %c0_6, %c0_7], %3 {strides = array<i32>} : memref<2x8x128xf32, #tpu.memory_space<vmem>>, vector<2x8x128xf32>,
    return
  }
  func.func @transform_0(%arg0: i32, %arg1: i32, %arg2: i32) -> (i32, i32, i32) {
    %c0_i32 = arith.constant 0 : i32
    return %arg0, %arg1, %arg2 : i32, i32, i32
  }
  func.func @transform_1(%arg0: i32, %arg1: i32, %arg2: i32) -> (i32, i32, i32) {
    %c0_i32 = arith.constant 0 : i32
    %c0_i32_0 = arith.constant 0 : i32
    return %arg0, %c0_i32, %arg2 : i32, i32, i32
  }
  func.func @transform_2(%arg0: i32, %arg1: i32, %arg2: i32) -> (i32, i32, i32) {
    %c0_i32 = arith.constant 0 : i32
    return %arg0, %arg1, %arg2 : i32, i32, i32
  }
}

</mosaic_0001>

<bundles_post_ra>
// kernel: tpu_custom_call.1
= control target key start
LH: loop header
LB: loop body
LE: loop exit
PB: predicated region body
PF: predicated region fallthrough
CT: control target
= control target key end

     0   :  { %7 = vsyncpa [#allocation3], 0  ;;  %s202_s0 = inlined_call_operand.hbm [shape: f32[2,8,128], index: 0, kind: input, shape index: {}]   ;;  %s203_s1 = inlined_call_operand.hbm [shape: f32[2,1,128], index: 1, kind: input, shape index: {}]   ;;  %s204_s2 = inlined_call_operand.hbm [shape: f32[2,8,128], index: 2, kind: output, shape index: {}]  }
   0x1   :  { %8 = vsyncpa [#allocation6], 0 }
   0x2   :  { %9 = vsyncpa [#allocation4], 0  ;;  %s14_s11 = sshll.u32 %s202_s0, 4  ;;  %s165_s12 = smov [#allocation2]   ;;  %s15_s11 = int_to_ptr.hbm [resolvable:$true] %s14_s11 }
   0x3   :  { %s16_s13 = sshll.u32 %s165_s12, 4  ;;  %s27_s16 = sshll.u32 %s203_s1, 4  ;;  %s17_s13 = int_to_ptr.vmem [resolvable:$true] %s16_s13  ;;  %s28_s16 = int_to_ptr.hbm [resolvable:$true] %s27_s16 }
   0x4   :  { %s166_s17 = smov 128   ;;  %s167_s18 = smov 8  }
   0x5   :  { %22 = dma.hbm_to_vmem [thread:$0]  %s15_s11, 256, %s17_s13, [#allocation3], %s166_s17, %s166_s17, %s167_s18  }
   0x6   :  { %s168_s19 = smov [#allocation5]   ;;  %s169_s21 = smov 16  }
   0x7   :  { %s29_s20 = sshll.u32 %s168_s19, 4  ;;  %s170_s0 = smov 1   ;;  %s30_s20 = int_to_ptr.vmem [resolvable:$true] %s29_s20 }
   0x8   :  { %35 = dma.hbm_to_vmem [thread:$0]  %s28_s16, 32, %s30_s20, [#allocation6], %s169_s21, %s169_s21, %s170_s0  }
   0x9   :  { %159 = dma.done.wait [#allocation3], 256  }
   0xa   :  { %160 = vsyncadd [#allocation3], 4294967040 }
   0xb   :  { %161 = dma.done.wait [#allocation6], 32  }
   0xc   :  { %162 = vsyncadd [#allocation6], 4294967264  ;;  %s64_s1 = sshll.u32 %s204_s2, 4  ;;  %v44_v0 = vld [vmem:[#allocation2] sm:$0xff]  ;;  %v85_v1 = vld [vmem:[#allocation5] ss:$0 sm:$0xff]  ;;  %s65_s1 = int_to_ptr.hbm [resolvable:$true] %s64_s1 }
   0xd   :  { %s171_s24 = smov [#allocation7]   ;;  %v45_v2 = vld [vmem:[#allocation2 + $0x8] sm:$0xff]  ;;  %v86_v3 = vld [vmem:[#allocation5 + $0x1] ss:$0 sm:$0xff]  ;;  %v54_v4 = vmul.f32 %v85_v1, %v44_v0 }
   0xe   :  { %s62_s25 = sshll.u32 %s171_s24, 4  ;;  %v55_v5 = vmul.f32 %v86_v3, %v45_v2  ;;  %s63_s25 = int_to_ptr.vmem [resolvable:$true] %s62_s25 }
   0xf   :  { %56 = vst [vmem:[#allocation7] sm:$0xff] %v54_v4 }
  0x10   :  { %57 = vst [vmem:[#allocation7 + $0x8] sm:$0xff] %v55_v5 }
  0x11   :  { %70 = dma.vmem_to_hbm [thread:$0]  %s63_s25, 256, %s65_s1, [#allocation4], %s166_s17, %s166_s17, %s167_s18  }
  0x12   :  { %163 = dma.done.wait [#allocation4], 256  }
  0x13   :  { %164 = vsyncadd [#allocation4], 4294967040 }
  0x14   :  { %75 = vsyncpa [#allocation3], 1 }
  0x15   :  { %76 = vsyncpa [#allocation6], 1 }
  0x16   :  { %77 = vsyncpa [#allocation4], 1 }

</bundles_post_ra>
